<compile_context>
chip_gen: v6e
topology: v6e:2x2x1
jax: 0.10.0
libtpu: 0.0.40
codegen_flags: <defaults>
</compile_context>

<pallas_src>
import jax
import jax.numpy as jnp
from jax import lax
from jax.experimental import pallas as pl
from jax.experimental.pallas import tpu as pltpu


def _lstm_map_kernel(xs_ref, wih_ref, whh_ref, b_ref, h0_ref, c0_ref, ys_ref):
    # xs_ref : [1, N, Din] bf16   (one element of the mapped-over list)
    # wih_ref: [Din, 4H]  bf16    whh_ref: [H, 4H] bf16    b_ref: [1, 4H] f32
    # h0_ref : [1, H] f32         c0_ref : [1, H] f32
    # ys_ref : [1, N, H] f32
    N = xs_ref.shape[1]
    H = h0_ref.shape[1]

    # Input projection for all timesteps in one MXU matmul.  At these sizes the
    # [N, 4H] f32 result is a single vreg: keep it register-resident (no VMEM scratch).
    xw = jnp.dot(xs_ref[0], wih_ref[...], preferred_element_type=jnp.float32) + b_ref[...]

    whh = whh_ref[...]           # hoisted: W_hh^T stays resident across all steps
    h = h0_ref[...]              # [1, H] f32
    c = c0_ref[...]              # [1, H] f32

    # Accumulate hidden states in-register; one dense [N, H] store at the end.
    row_ids = lax.broadcasted_iota(jnp.int32, (N, H), 0)
    ys = jnp.zeros((N, H), jnp.float32)

    # Static unroll of the recurrence (N is tiny & static): exposes the full
    # dependency chain and makes every slice index static.
    # NOTE: the recurrent [1,H]x[H,4H] matmul uses <1% of the MXU; a VPU
    # broadcast-MAC alternative could be evaluated if this ever dominates.
    for t in range(N):
        gates = xw[t:t + 1, :] + jnp.dot(
            h.astype(jnp.bfloat16), whh, preferred_element_type=jnp.float32
        )  # [1, 4H] f32, gate order i|f|g|o (PyTorch LSTMCell)

        # One sigmoid pass and one tanh pass over the full 4H-lane vector, then slice.
        sg = jax.nn.sigmoid(gates)
        th = jnp.tanh(gates)
        i = sg[:, 0 * H:1 * H]
        f = sg[:, 1 * H:2 * H]
        g = th[:, 2 * H:3 * H]
        o = sg[:, 3 * H:4 * H]

        c = f * c + i * g
        h = o * jnp.tanh(c)
        ys = jnp.where(row_ids == t, h, ys)   # register-resident row update

    ys_ref[0] = ys


def prepare_lstm_params(w_ih, w_hh, b_ih, b_hh):
    """One-time parameter prep (amortized across calls): transpose, fuse bias, cast bf16."""
    wih_t = jnp.asarray(w_ih, jnp.float32).T.astype(jnp.bfloat16)   # [Din, 4H]
    whh_t = jnp.asarray(w_hh, jnp.float32).T.astype(jnp.bfloat16)   # [H, 4H]
    bias = (jnp.asarray(b_ih, jnp.float32) + jnp.asarray(b_hh, jnp.float32)).reshape(1, -1)
    return wih_t, whh_t, bias


def lstm_map_pallas(xs, params, h0, c0):
    """Map the LSTM element-module over the list of sequences.

    xs: [B, N, Din] float32 (B independent elements), params from prepare_lstm_params,
    h0/c0: [1, H] float32 shared initial state.  Returns ys: [B, N, H] float32.
    """
    wih_t, whh_t, bias = params
    B, N, Din = xs.shape
    H = h0.shape[1]

    xs_b = jnp.asarray(xs).astype(jnp.bfloat16)
    h0 = jnp.asarray(h0, jnp.float32)
    c0 = jnp.asarray(c0, jnp.float32)

    grid_spec = pltpu.PrefetchScalarGridSpec(
        num_scalar_prefetch=0,
        grid=(B,),
        in_specs=[
            pl.BlockSpec((1, N, Din), lambda b: (b, 0, 0)),      # one list element
            pl.BlockSpec((Din, 4 * H), lambda b: (0, 0)),        # W_ih^T (shared)
            pl.BlockSpec((H, 4 * H), lambda b: (0, 0)),          # W_hh^T (shared)
            pl.BlockSpec((1, 4 * H), lambda b: (0, 0)),          # fused bias
            pl.BlockSpec((1, H), lambda b: (0, 0)),              # h0
            pl.BlockSpec((1, H), lambda b: (0, 0)),              # c0
        ],
        out_specs=pl.BlockSpec((1, N, H), lambda b: (b, 0, 0)),
    )

    return pl.pallas_call(
        _lstm_map_kernel,
        out_shape=jax.ShapeDtypeStruct((B, N, H), jnp.float32),
        grid_spec=grid_spec,
        compiler_params=pltpu.CompilerParams(dimension_semantics=("parallel",)),
    )(xs_b, wih_t, whh_t, bias, h0, c0)


def simple_lstm_ref(xs, w_ih, w_hh, b_ih, b_hh, h0, c0):
    """Pure-JAX f32 reference for one element (torch.nn.LSTMCell semantics)."""
    H = h0.shape[1]

    def step(carry, x):
        h, c = carry
        gates = x @ w_ih.T + b_ih + h @ w_hh.T + b_hh  # [1, 4H]
        i = jax.nn.sigmoid(gates[:, 0 * H:1 * H])
        f = jax.nn.sigmoid(gates[:, 1 * H:2 * H])
        g = jnp.tanh(gates[:, 2 * H:3 * H])
        o = jax.nn.sigmoid(gates[:, 3 * H:4 * H])
        c_new = f * c + i * g
        h_new = o * jnp.tanh(c_new)
        return (h_new, c_new), h_new[0]

    (_, _), ys = lax.scan(step, (h0, c0), xs[:, None, :])
    return ys


if __name__ == "__main__":
    B, N, DIN, DOUT = 2, 8, 16, 32  # list length, seq length, input size, hidden size

    key = jax.random.PRNGKey(0)
    k_h0, k_c0, k_wih, k_whh, k_bih, k_bhh, k_x = jax.random.split(key, 7)

    bound = 1.0 / jnp.sqrt(DOUT)
    h0 = jax.random.normal(k_h0, (1, DOUT), jnp.float32)
    c0 = jax.random.normal(k_c0, (1, DOUT), jnp.float32)
    w_ih = jax.random.uniform(k_wih, (4 * DOUT, DIN), jnp.float32, -bound, bound)
    w_hh = jax.random.uniform(k_whh, (4 * DOUT, DOUT), jnp.float32, -bound, bound)
    b_ih = jax.random.uniform(k_bih, (4 * DOUT,), jnp.float32, -bound, bound)
    b_hh = jax.random.uniform(k_bhh, (4 * DOUT,), jnp.float32, -bound, bound)

    # The "list" of inputs Map iterates over, as a stacked [B, N, Din] array.
    xs = jax.random.normal(k_x, (B, N, DIN), jnp.float32)

    params = prepare_lstm_params(w_ih, w_hh, b_ih, b_hh)   # amortized, not per-call

    ys = lstm_map_pallas(xs, params, h0, c0)
    jax.block_until_ready(ys)

    ys_ref = jnp.stack(
        [simple_lstm_ref(xs[b], w_ih, w_hh, b_ih, b_hh, h0, c0) for b in range(B)]
    )
    assert ys.shape == (B, N, DOUT)
    # bf16 matmul inputs with f32 accumulation -> compare with bf16-appropriate tolerance.
    assert jnp.allclose(ys, ys_ref, rtol=2e-2, atol=2e-2), "mismatch vs reference"

    print("KERNEL_OK")
</pallas_src>

<mosaic_0001>
module attributes {stable_mosaic.version = 11 : i64} {
  func.func @_lstm_map_kernel(%arg0: i32, %arg1: memref<1x8x16xbf16, #tpu.memory_space<vmem>>, %arg2: memref<16x128xbf16, #tpu.memory_space<vmem>>, %arg3: memref<32x128xbf16, #tpu.memory_space<vmem>>, %arg4: memref<1x128xf32, #tpu.memory_space<vmem>>, %arg5: memref<1x32xf32, #tpu.memory_space<vmem>>, %arg6: memref<1x32xf32, #tpu.memory_space<vmem>>, %arg7: memref<1x8x32xf32, #tpu.memory_space<vmem>>) attributes {dimension_semantics = [#tpu.dimension_semantics<parallel>], iteration_bounds = array<i64: 2>, scalar_prefetch = 0 : i64, scratch_operands = 0 : i64, tpu.core_type = #tpu.core_type<tc>, window_params = [{transform_indices = @transform_0, window_bounds = array<i64: 1, 8, 16>}, {pipeline_mode = #tpu.pipeline_mode<synchronous>, transform_indices = @transform_1, window_bounds = array<i64: 16, 128>}, {pipeline_mode = #tpu.pipeline_mode<synchronous>, transform_indices = @transform_2, window_bounds = array<i64: 32, 128>}, {pipeline_mode = #tpu.pipeline_mode<synchronous>, transform_indices = @transform_3, window_bounds = array<i64: 1, 128>}, {pipeline_mode = #tpu.pipeline_mode<synchronous>, transform_indices = @transform_4, window_bounds = array<i64: 1, 32>}, {pipeline_mode = #tpu.pipeline_mode<synchronous>, transform_indices = @transform_5, window_bounds = array<i64: 1, 32>}, {transform_indices = @transform_6, window_bounds = array<i64: 1, 8, 32>}]} {
    %c0 = arith.constant 0 : index
    %c0_0 = arith.constant 0 : index
    %c0_1 = arith.constant 0 : index
    %0 = vector.load %arg1[%c0, %c0_0, %c0_1] : memref<1x8x16xbf16, #tpu.memory_space<vmem>>, vector<1x8x16xbf16>
    %1 = vector.shape_cast %0 : vector<1x8x16xbf16> to vector<8x16xbf16>
    %c0_2 = arith.constant 0 : index
    %c0_3 = arith.constant 0 : index
    %2 = vector.load %arg2[%c0_2, %c0_3] : memref<16x128xbf16, #tpu.memory_space<vmem>>, vector<16x128xbf16>
    %cst = arith.constant dense<0.000000e+00> : vector<8x128xf32>
    %3 = tpu.matmul %1, %2, %cst {dimension_numbers = #tpu.dot_dimension_numbers<[1], [0], [0], [1], [0, 0, 1, 1], [], []>} : vector<8x16xbf16>, vector<16x128xbf16>, vector<8x128xf32> -> vector<8x128xf32>
    %c0_4 = arith.constant 0 : index
    %c0_5 = arith.constant 0 : index
    %4 = vector.load %arg4[%c0_4, %c0_5] : memref<1x128xf32, #tpu.memory_space<vmem>>, vector<1x128xf32>
    %5 = vector.broadcast %4 : vector<1x128xf32> to vector<8x128xf32>
    %6 = arith.addf %3, %5 : vector<8x128xf32>
    %c0_6 = arith.constant 0 : index
    %c0_7 = arith.constant 0 : index
    %7 = vector.load %arg3[%c0_6, %c0_7] : memref<32x128xbf16, #tpu.memory_space<vmem>>, vector<32x128xbf16>
    %c0_8 = arith.constant 0 : index
    %c0_9 = arith.constant 0 : index
    %8 = vector.load %arg5[%c0_8, %c0_9] : memref<1x32xf32, #tpu.memory_space<vmem>>, vector<1x32xf32>
    %c0_10 = arith.constant 0 : index
    %c0_11 = arith.constant 0 : index
    %9 = vector.load %arg6[%c0_10, %c0_11] : memref<1x32xf32, #tpu.memory_space<vmem>>, vector<1x32xf32>
    %10 = tpu.iota {dimensions = array<i32: 0>} : vector<8x32xi32>
    %cst_12 = arith.constant 0.000000e+00 : f32
    %11 = vector.broadcast %cst_12 : f32 to vector<8x32xf32>
    %12 = vector.extract_strided_slice %6 {offsets = [0, 0], sizes = [1, 128], strides = [1, 1]} : vector<8x128xf32> to vector<1x128xf32>
    %13 = arith.truncf %8 : vector<1x32xf32> to vector<1x32xbf16>
    %cst_13 = arith.constant dense<0.000000e+00> : vector<1x128xf32>
    %14 = tpu.matmul %13, %7, %cst_13 {dimension_numbers = #tpu.dot_dimension_numbers<[1], [0], [0], [1], [0, 0, 1, 1], [], []>} : vector<1x32xbf16>, vector<32x128xbf16>, vector<1x128xf32> -> vector<1x128xf32>
    %15 = arith.addf %12, %14 : vector<1x128xf32>
    %16 = arith.negf %15 : vector<1x128xf32>
    %17 = math.exp %16 : vector<1x128xf32>
    %cst_14 = arith.constant 1.000000e+00 : f32
    %18 = vector.broadcast %cst_14 : f32 to vector<1x128xf32>
    %19 = arith.addf %18, %17 : vector<1x128xf32>
    %20 = arith.divf %18, %19 : vector<1x128xf32>
    %21 = math.tanh %15 : vector<1x128xf32>
    %22 = vector.extract_strided_slice %20 {offsets = [0, 0], sizes = [1, 32], strides = [1, 1]} : vector<1x128xf32> to vector<1x32xf32>
    %23 = vector.extract_strided_slice %20 {offsets = [0, 32], sizes = [1, 32], strides = [1, 1]} : vector<1x128xf32> to vector<1x32xf32>
    %24 = vector.extract_strided_slice %21 {offsets = [0, 64], sizes = [1, 32], strides = [1, 1]} : vector<1x128xf32> to vector<1x32xf32>
    %25 = vector.extract_strided_slice %20 {offsets = [0, 96], sizes = [1, 32], strides = [1, 1]} : vector<1x128xf32> to vector<1x32xf32>
    %26 = arith.mulf %23, %9 : vector<1x32xf32>
    %27 = arith.mulf %22, %24 : vector<1x32xf32>
    %28 = arith.addf %26, %27 : vector<1x32xf32>
    %29 = math.tanh %28 : vector<1x32xf32>
    %30 = arith.mulf %25, %29 : vector<1x32xf32>
    %c0_i32 = arith.constant 0 : i32
    %31 = vector.broadcast %c0_i32 : i32 to vector<8x32xi32>
    %32 = arith.cmpi eq, %10, %31 : vector<8x32xi32>
    %33 = vector.shape_cast %30 : vector<1x32xf32> to vector<1x32xf32>
    %34 = vector.broadcast %33 : vector<1x32xf32> to vector<8x32xf32>
    %35 = arith.select %32, %34, %11 : vector<8x32xi1>, vector<8x32xf32>
    %36 = vector.extract_strided_slice %6 {offsets = [1, 0], sizes = [1, 128], strides = [1, 1]} : vector<8x128xf32> to vector<1x128xf32>
    %37 = arith.truncf %30 : vector<1x32xf32> to vector<1x32xbf16>
    %cst_15 = arith.constant dense<0.000000e+00> : vector<1x128xf32>
    %38 = tpu.matmul %37, %7, %cst_15 {dimension_numbers = #tpu.dot_dimension_numbers<[1], [0], [0], [1], [0, 0, 1, 1], [], []>} : vector<1x32xbf16>, vector<32x128xbf16>, vector<1x128xf32> -> vector<1x128xf32>
    %39 = arith.addf %36, %38 : vector<1x128xf32>
    %40 = arith.negf %39 : vector<1x128xf32>
    %41 = math.exp %40 : vector<1x128xf32>
    %cst_16 = arith.constant 1.000000e+00 : f32
    %42 = vector.broadcast %cst_16 : f32 to vector<1x128xf32>
    %43 = arith.addf %42, %41 : vector<1x128xf32>
    %44 = arith.divf %42, %43 : vector<1x128xf32>
    %45 = math.tanh %39 : vector<1x128xf32>
    %46 = vector.extract_strided_slice %44 {offsets = [0, 0], sizes = [1, 32], strides = [1, 1]} : vector<1x128xf32> to vector<1x32xf32>
    %47 = vector.extract_strided_slice %44 {offsets = [0, 32], sizes = [1, 32], strides = [1, 1]} : vector<1x128xf32> to vector<1x32xf32>
    %48 = vector.extract_strided_slice %45 {offsets = [0, 64], sizes = [1, 32], strides = [1, 1]} : vector<1x128xf32> to vector<1x32xf32>
    %49 = vector.extract_strided_slice %44 {offsets = [0, 96], sizes = [1, 32], strides = [1, 1]} : vector<1x128xf32> to vector<1x32xf32>
    %50 = arith.mulf %47, %28 : vector<1x32xf32>
    %51 = arith.mulf %46, %48 : vector<1x32xf32>
    %52 = arith.addf %50, %51 : vector<1x32xf32>
    %53 = math.tanh %52 : vector<1x32xf32>
    %54 = arith.mulf %49, %53 : vector<1x32xf32>
    %c1_i32 = arith.constant 1 : i32
    %55 = vector.broadcast %c1_i32 : i32 to vector<8x32xi32>
    %56 = arith.cmpi eq, %10, %55 : vector<8x32xi32>
    %57 = vector.shape_cast %54 : vector<1x32xf32> to vector<1x32xf32>
    %58 = vector.broadcast %57 : vector<1x32xf32> to vector<8x32xf32>
    %59 = arith.select %56, %58, %35 : vector<8x32xi1>, vector<8x32xf32>
    %60 = vector.extract_strided_slice %6 {offsets = [2, 0], sizes = [1, 128], strides = [1, 1]} : vector<8x128xf32> to vector<1x128xf32>
    %61 = arith.truncf %54 : vector<1x32xf32> to vector<1x32xbf16>
    %cst_17 = arith.constant dense<0.000000e+00> : vector<1x128xf32>
    %62 = tpu.matmul %61, %7, %cst_17 {dimension_numbers = #tpu.dot_dimension_numbers<[1], [0], [0], [1], [0, 0, 1, 1], [], []>} : vector<1x32xbf16>, vector<32x128xbf16>, vector<1x128xf32> -> vector<1x128xf32>
    %63 = arith.addf %60, %62 : vector<1x128xf32>
    %64 = arith.negf %63 : vector<1x128xf32>
    %65 = math.exp %64 : vector<1x128xf32>
    %cst_18 = arith.constant 1.000000e+00 : f32
    %66 = vector.broadcast %cst_18 : f32 to vector<1x128xf32>
    %67 = arith.addf %66, %65 : vector<1x128xf32>
    %68 = arith.divf %66, %67 : vector<1x128xf32>
    %69 = math.tanh %63 : vector<1x128xf32>
    %70 = vector.extract_strided_slice %68 {offsets = [0, 0], sizes = [1, 32], strides = [1, 1]} : vector<1x128xf32> to vector<1x32xf32>
    %71 = vector.extract_strided_slice %68 {offsets = [0, 32], sizes = [1, 32], strides = [1, 1]} : vector<1x128xf32> to vector<1x32xf32>
    %72 = vector.extract_strided_slice %69 {offsets = [0, 64], sizes = [1, 32], strides = [1, 1]} : vector<1x128xf32> to vector<1x32xf32>
    %73 = vector.extract_strided_slice %68 {offsets = [0, 96], sizes = [1, 32], strides = [1, 1]} : vector<1x128xf32> to vector<1x32xf32>
    %74 = arith.mulf %71, %52 : vector<1x32xf32>
    %75 = arith.mulf %70, %72 : vector<1x32xf32>
    %76 = arith.addf %74, %75 : vector<1x32xf32>
    %77 = math.tanh %76 : vector<1x32xf32>
    %78 = arith.mulf %73, %77 : vector<1x32xf32>
    %c2_i32 = arith.constant 2 : i32
    %79 = vector.broadcast %c2_i32 : i32 to vector<8x32xi32>
    %80 = arith.cmpi eq, %10, %79 : vector<8x32xi32>
    %81 = vector.shape_cast %78 : vector<1x32xf32> to vector<1x32xf32>
    %82 = vector.broadcast %81 : vector<1x32xf32> to vector<8x32xf32>
    %83 = arith.select %80, %82, %59 : vector<8x32xi1>, vector<8x32xf32>
    %84 = vector.extract_strided_slice %6 {offsets = [3, 0], sizes = [1, 128], strides = [1, 1]} : vector<8x128xf32> to vector<1x128xf32>
    %85 = arith.truncf %78 : vector<1x32xf32> to vector<1x32xbf16>
    %cst_19 = arith.constant dense<0.000000e+00> : vector<1x128xf32>
    %86 = tpu.matmul %85, %7, %cst_19 {dimension_numbers = #tpu.dot_dimension_numbers<[1], [0], [0], [1], [0, 0, 1, 1], [], []>} : vector<1x32xbf16>, vector<32x128xbf16>, vector<1x128xf32> -> vector<1x128xf32>
    %87 = arith.addf %84, %86 : vector<1x128xf32>
    %88 = arith.negf %87 : vector<1x128xf32>
    %89 = math.exp %88 : vector<1x128xf32>
    %cst_20 = arith.constant 1.000000e+00 : f32
    %90 = vector.broadcast %cst_20 : f32 to vector<1x128xf32>
    %91 = arith.addf %90, %89 : vector<1x128xf32>
    %92 = arith.divf %90, %91 : vector<1x128xf32>
    %93 = math.tanh %87 : vector<1x128xf32>
    %94 = vector.extract_strided_slice %92 {offsets = [0, 0], sizes = [1, 32], strides = [1, 1]} : vector<1x128xf32> to vector<1x32xf32>
    %95 = vector.extract_strided_slice %92 {offsets = [0, 32], sizes = [1, 32], strides = [1, 1]} : vector<1x128xf32> to vector<1x32xf32>
    %96 = vector.extract_strided_slice %93 {offsets = [0, 64], sizes = [1, 32], strides = [1, 1]} : vector<1x128xf32> to vector<1x32xf32>
    %97 = vector.extract_strided_slice %92 {offsets = [0, 96], sizes = [1, 32], strides = [1, 1]} : vector<1x128xf32> to vector<1x32xf32>
    %98 = arith.mulf %95, %76 : vector<1x32xf32>
    %99 = arith.mulf %94, %96 : vector<1x32xf32>
    %100 = arith.addf %98, %99 : vector<1x32xf32>
    %101 = math.tanh %100 : vector<1x32xf32>
    %102 = arith.mulf %97, %101 : vector<1x32xf32>
    %c3_i32 = arith.constant 3 : i32
    %103 = vector.broadcast %c3_i32 : i32 to vector<8x32xi32>
    %104 = arith.cmpi eq, %10, %103 : vector<8x32xi32>
    %105 = vector.shape_cast %102 : vector<1x32xf32> to vector<1x32xf32>
    %106 = vector.broadcast %105 : vector<1x32xf32> to vector<8x32xf32>
    %107 = arith.select %104, %106, %83 : vector<8x32xi1>, vector<8x32xf32>
    %108 = vector.extract_strided_slice %6 {offsets = [4, 0], sizes = [1, 128], strides = [1, 1]} : vector<8x128xf32> to vector<1x128xf32>
    %109 = arith.truncf %102 : vector<1x32xf32> to vector<1x32xbf16>
    %cst_21 = arith.constant dense<0.000000e+00> : vector<1x128xf32>
    %110 = tpu.matmul %109, %7, %cst_21 {dimension_numbers = #tpu.dot_dimension_numbers<[1], [0], [0], [1], [0, 0, 1, 1], [], []>} : vector<1x32xbf16>, vector<32x128xbf16>, vector<1x128xf32> -> vector<1x128xf32>
    %111 = arith.addf %108, %110 : vector<1x128xf32>
    %112 = arith.negf %111 : vector<1x128xf32>
    %113 = math.exp %112 : vector<1x128xf32>
    %cst_22 = arith.constant 1.000000e+00 : f32
    %114 = vector.broadcast %cst_22 : f32 to vector<1x128xf32>
    %115 = arith.addf %114, %113 : vector<1x128xf32>
    %116 = arith.divf %114, %115 : vector<1x128xf32>
    %117 = math.tanh %111 : vector<1x128xf32>
    %118 = vector.extract_strided_slice %116 {offsets = [0, 0], sizes = [1, 32], strides = [1, 1]} : vector<1x128xf32> to vector<1x32xf32>
    %119 = vector.extract_strided_slice %116 {offsets = [0, 32], sizes = [1, 32], strides = [1, 1]} : vector<1x128xf32> to vector<1x32xf32>
    %120 = vector.extract_strided_slice %117 {offsets = [0, 64], sizes = [1, 32], strides = [1, 1]} : vector<1x128xf32> to vector<1x32xf32>
    %121 = vector.extract_strided_slice %116 {offsets = [0, 96], sizes = [1, 32], strides = [1, 1]} : vector<1x128xf32> to vector<1x32xf32>
    %122 = arith.mulf %119, %100 : vector<1x32xf32>
    %123 = arith.mulf %118, %120 : vector<1x32xf32>
    %124 = arith.addf %122, %123 : vector<1x32xf32>
    %125 = math.tanh %124 : vector<1x32xf32>
    %126 = arith.mulf %121, %125 : vector<1x32xf32>
    %c4_i32 = arith.constant 4 : i32
    %127 = vector.broadcast %c4_i32 : i32 to vector<8x32xi32>
    %128 = arith.cmpi eq, %10, %127 : vector<8x32xi32>
    %129 = vector.shape_cast %126 : vector<1x32xf32> to vector<1x32xf32>
    %130 = vector.broadcast %129 : vector<1x32xf32> to vector<8x32xf32>
    %131 = arith.select %128, %130, %107 : vector<8x32xi1>, vector<8x32xf32>
    %132 = vector.extract_strided_slice %6 {offsets = [5, 0], sizes = [1, 128], strides = [1, 1]} : vector<8x128xf32> to vector<1x128xf32>
    %133 = arith.truncf %126 : vector<1x32xf32> to vector<1x32xbf16>
    %cst_23 = arith.constant dense<0.000000e+00> : vector<1x128xf32>
    %134 = tpu.matmul %133, %7, %cst_23 {dimension_numbers = #tpu.dot_dimension_numbers<[1], [0], [0], [1], [0, 0, 1, 1], [], []>} : vector<1x32xbf16>, vector<32x128xbf16>, vector<1x128xf32> -> vector<1x128xf32>
    %135 = arith.addf %132, %134 : vector<1x128xf32>
    %136 = arith.negf %135 : vector<1x128xf32>
    %137 = math.exp %136 : vector<1x128xf32>
    %cst_24 = arith.constant 1.000000e+00 : f32
    %138 = vector.broadcast %cst_24 : f32 to vector<1x128xf32>
    %139 = arith.addf %138, %137 : vector<1x128xf32>
    %140 = arith.divf %138, %139 : vector<1x128xf32>
    %141 = math.tanh %135 : vector<1x128xf32>
    %142 = vector.extract_strided_slice %140 {offsets = [0, 0], sizes = [1, 32], strides = [1, 1]} : vector<1x128xf32> to vector<1x32xf32>
    %143 = vector.extract_strided_slice %140 {offsets = [0, 32], sizes = [1, 32], strides = [1, 1]} : vector<1x128xf32> to vector<1x32xf32>
    %144 = vector.extract_strided_slice %141 {offsets = [0, 64], sizes = [1, 32], strides = [1, 1]} : vector<1x128xf32> to vector<1x32xf32>
    %145 = vector.extract_strided_slice %140 {offsets = [0, 96], sizes = [1, 32], strides = [1, 1]} : vector<1x128xf32> to vector<1x32xf32>
    %146 = arith.mulf %143, %124 : vector<1x32xf32>
    %147 = arith.mulf %142, %144 : vector<1x32xf32>
    %148 = arith.addf %146, %147 : vector<1x32xf32>
    %149 = math.tanh %148 : vector<1x32xf32>
    %150 = arith.mulf %145, %149 : vector<1x32xf32>
    %c5_i32 = arith.constant 5 : i32
    %151 = vector.broadcast %c5_i32 : i32 to vector<8x32xi32>
    %152 = arith.cmpi eq, %10, %151 : vector<8x32xi32>
    %153 = vector.shape_cast %150 : vector<1x32xf32> to vector<1x32xf32>
    %154 = vector.broadcast %153 : vector<1x32xf32> to vector<8x32xf32>
    %155 = arith.select %152, %154, %131 : vector<8x32xi1>, vector<8x32xf32>
    %156 = vector.extract_strided_slice %6 {offsets = [6, 0], sizes = [1, 128], strides = [1, 1]} : vector<8x128xf32> to vector<1x128xf32>
    %157 = arith.truncf %150 : vector<1x32xf32> to vector<1x32xbf16>
    %cst_25 = arith.constant dense<0.000000e+00> : vector<1x128xf32>
    %158 = tpu.matmul %157, %7, %cst_25 {dimension_numbers = #tpu.dot_dimension_numbers<[1], [0], [0], [1], [0, 0, 1, 1], [], []>} : vector<1x32xbf16>, vector<32x128xbf16>, vector<1x128xf32> -> vector<1x128xf32>
    %159 = arith.addf %156, %158 : vector<1x128xf32>
    %160 = arith.negf %159 : vector<1x128xf32>
    %161 = math.exp %160 : vector<1x128xf32>
    %cst_26 = arith.constant 1.000000e+00 : f32
    %162 = vector.broadcast %cst_26 : f32 to vector<1x128xf32>
    %163 = arith.addf %162, %161 : vector<1x128xf32>
    %164 = arith.divf %162, %163 : vector<1x128xf32>
    %165 = math.tanh %159 : vector<1x128xf32>
    %166 = vector.extract_strided_slice %164 {offsets = [0, 0], sizes = [1, 32], strides = [1, 1]} : vector<1x128xf32> to vector<1x32xf32>
    %167 = vector.extract_strided_slice %164 {offsets = [0, 32], sizes = [1, 32], strides = [1, 1]} : vector<1x128xf32> to vector<1x32xf32>
    %168 = vector.extract_strided_slice %165 {offsets = [0, 64], sizes = [1, 32], strides = [1, 1]} : vector<1x128xf32> to vector<1x32xf32>
    %169 = vector.extract_strided_slice %164 {offsets = [0, 96], sizes = [1, 32], strides = [1, 1]} : vector<1x128xf32> to vector<1x32xf32>
    %170 = arith.mulf %167, %148 : vector<1x32xf32>
    %171 = arith.mulf %166, %168 : vector<1x32xf32>
    %172 = arith.addf %170, %171 : vector<1x32xf32>
    %173 = math.tanh %172 : vector<1x32xf32>
    %174 = arith.mulf %169, %173 : vector<1x32xf32>
    %c6_i32 = arith.constant 6 : i32
    %175 = vector.broadcast %c6_i32 : i32 to vector<8x32xi32>
    %176 = arith.cmpi eq, %10, %175 : vector<8x32xi32>
    %177 = vector.shape_cast %174 : vector<1x32xf32> to vector<1x32xf32>
    %178 = vector.broadcast %177 : vector<1x32xf32> to vector<8x32xf32>
    %179 = arith.select %176, %178, %155 : vector<8x32xi1>, vector<8x32xf32>
    %180 = vector.extract_strided_slice %6 {offsets = [7, 0], sizes = [1, 128], strides = [1, 1]} : vector<8x128xf32> to vector<1x128xf32>
    %181 = arith.truncf %174 : vector<1x32xf32> to vector<1x32xbf16>
    %cst_27 = arith.constant dense<0.000000e+00> : vector<1x128xf32>
    %182 = tpu.matmul %181, %7, %cst_27 {dimension_numbers = #tpu.dot_dimension_numbers<[1], [0], [0], [1], [0, 0, 1, 1], [], []>} : vector<1x32xbf16>, vector<32x128xbf16>, vector<1x128xf32> -> vector<1x128xf32>
    %183 = arith.addf %180, %182 : vector<1x128xf32>
    %184 = arith.negf %183 : vector<1x128xf32>
    %185 = math.exp %184 : vector<1x128xf32>
    %cst_28 = arith.constant 1.000000e+00 : f32
    %186 = vector.broadcast %cst_28 : f32 to vector<1x128xf32>
    %187 = arith.addf %186, %185 : vector<1x128xf32>
    %188 = arith.divf %186, %187 : vector<1x128xf32>
    %189 = math.tanh %183 : vector<1x128xf32>
    %190 = vector.extract_strided_slice %188 {offsets = [0, 0], sizes = [1, 32], strides = [1, 1]} : vector<1x128xf32> to vector<1x32xf32>
    %191 = vector.extract_strided_slice %188 {offsets = [0, 32], sizes = [1, 32], strides = [1, 1]} : vector<1x128xf32> to vector<1x32xf32>
    %192 = vector.extract_strided_slice %189 {offsets = [0, 64], sizes = [1, 32], strides = [1, 1]} : vector<1x128xf32> to vector<1x32xf32>
    %193 = vector.extract_strided_slice %188 {offsets = [0, 96], sizes = [1, 32], strides = [1, 1]} : vector<1x128xf32> to vector<1x32xf32>
    %194 = arith.mulf %191, %172 : vector<1x32xf32>
    %195 = arith.mulf %190, %192 : vector<1x32xf32>
    %196 = arith.addf %194, %195 : vector<1x32xf32>
    %197 = math.tanh %196 : vector<1x32xf32>
    %198 = arith.mulf %193, %197 : vector<1x32xf32>
    %c7_i32 = arith.constant 7 : i32
    %199 = vector.broadcast %c7_i32 : i32 to vector<8x32xi32>
    %200 = arith.cmpi eq, %10, %199 : vector<8x32xi32>
    %201 = vector.shape_cast %198 : vector<1x32xf32> to vector<1x32xf32>
    %202 = vector.broadcast %201 : vector<1x32xf32> to vector<8x32xf32>
    %203 = arith.select %200, %202, %179 : vector<8x32xi1>, vector<8x32xf32>
    %c0_29 = arith.constant 0 : index
    %c0_30 = arith.constant 0 : index
    %c0_31 = arith.constant 0 : index
    %204 = vector.load %arg7[%c0_29, %c0_30, %c0_31] : memref<1x8x32xf32, #tpu.memory_space<vmem>>, vector<1x8x32xf32>
    %205 = vector.shape_cast %204 : vector<1x8x32xf32> to vector<8x32xf32>
    %206 = vector.shape_cast %203 : vector<8x32xf32> to vector<1x8x32xf32>
    tpu.vector_store %arg7[%c0_29, %c0_30, %c0_31], %206 {strides = array<i32>} : memref<1x8x32xf32, #tpu.memory_space<vmem>>, vector<1x8x32xf32>,
    return
  }
  func.func @transform_0(%arg0: i32) -> (i32, i32, i32) {
    %c0_i32 = arith.constant 0 : i32
    %c0_i32_0 = arith.constant 0 : i32
    %c0_i32_1 = arith.constant 0 : i32
    return %arg0, %c0_i32, %c0_i32_0 : i32, i32, i32
  }
  func.func @transform_1(%arg0: i32) -> (i32, i32) {
    %c0_i32 = arith.constant 0 : i32
    %c0_i32_0 = arith.constant 0 : i32
    %c0_i32_1 = arith.constant 0 : i32
    return %c0_i32, %c0_i32_0 : i32, i32
  }
  func.func @transform_2(%arg0: i32) -> (i32, i32) {
    %c0_i32 = arith.constant 0 : i32
    %c0_i32_0 = arith.constant 0 : i32
    %c0_i32_1 = arith.constant 0 : i32
    return %c0_i32, %c0_i32_0 : i32, i32
  }
  func.func @transform_3(%arg0: i32) -> (i32, i32) {
    %c0_i32 = arith.constant 0 : i32
    %c0_i32_0 = arith.constant 0 : i32
    %c0_i32_1 = arith.constant 0 : i32
    return %c0_i32, %c0_i32_0 : i32, i32
  }
  func.func @transform_4(%arg0: i32) -> (i32, i32) {
    %c0_i32 = arith.constant 0 : i32
    %c0_i32_0 = arith.constant 0 : i32
    %c0_i32_1 = arith.constant 0 : i32
    return %c0_i32, %c0_i32_0 : i32, i32
  }
  func.func @transform_5(%arg0: i32) -> (i32, i32) {
    %c0_i32 = arith.constant 0 : i32
    %c0_i32_0 = arith.constant 0 : i32
    %c0_i32_1 = arith.constant 0 : i32
    return %c0_i32, %c0_i32_0 : i32, i32
  }
  func.func @transform_6(%arg0: i32) -> (i32, i32, i32) {
    %c0_i32 = arith.constant 0 : i32
    %c0_i32_0 = arith.constant 0 : i32
    %c0_i32_1 = arith.constant 0 : i32
    return %arg0, %c0_i32, %c0_i32_0 : i32, i32, i32
  }
}

</mosaic_0001>

<bundles_post_ra>
// kernel: tpu_custom_call.1
= control target key start
LH: loop header
LB: loop body
LE: loop exit
PB: predicated region body
PF: predicated region fallthrough
CT: control target
= control target key end

     0   :  { %s1943_s0 = inlined_call_operand.hbm [shape: bf16[2,8,16], index: 0, kind: input, shape index: {}]   ;;  %s1944_s1 = inlined_call_operand.hbm [shape: bf16[16,128], index: 1, kind: input, shape index: {}]   ;;  %s1945_s2 = inlined_call_operand.hbm [shape: bf16[32,128], index: 2, kind: input, shape index: {}]   ;;  %s1946_s3 = inlined_call_operand.vmem [shape: f32[1,128], index: 3, kind: input, shape index: {}]   ;;  %s1947_s4 = inlined_call_operand.vmem [shape: f32[1,32], index: 4, kind: input, shape index: {}]   ;;  %s1948_s5 = inlined_call_operand.vmem [shape: f32[1,32], index: 5, kind: input, shape index: {}]   ;;  %s1949_s6 = inlined_call_operand.hbm [shape: f32[2,8,32], index: 6, kind: output, shape index: {}]  }
   0x1   :  { %1954 = sst [smem:[#allocation12_spill]] %s1944_s1 }
   0x2   :  { %11 = vsyncpa [#allocation3], 0 }
   0x3   :  { %13 = vsyncpa [#allocation3 + $0x1], 0 }
   0x4   :  { %14 = vsyncpa [#allocation6], 0 }
   0x5   :  { %15 = vsyncpa [#allocation4], 0 }
   0x6   :  { %17 = vsyncpa [#allocation4 + $0x1], 0  ;;  %s1637_s21 = smov 0   ;;  %s1639_s22 = smov 0  }
   0x7   :  { %s1641_s23 = smov 0   ;;  %s1643_s24 = smov 0  }
   0x8 LB: > { %s1658_s25 = sadd.s32 4294967295, %s1590_s24   ;;  %s1168_s26 = sadd.s32 4294967294, %s1590_s24   ;;  %s1590_s24 = sphi %s1643_s24, %s1973_s24   ;;  %s1586_s23 = sphi %s1641_s23, %s1972_s23   ;;  %s1582_s22 = sphi %s1639_s22, %s1971_s22   ;;  %s1578_s21 = sphi %s1637_s21, %s1970_s21  }
   0x9   : > { %p43_p0 = scmp.ne.s32.totalorder %s1582_s22, %s1578_s21  ;;  %p1950_p1 = scmp.eq.s32.totalorder %s1658_s25, 0 }
   0xa   : > { %p178_p3 = scmp.eq.s32.totalorder %s1168_s26, 1  ;;  %p1169_p5 = scmp.ge.s32.totalorder %s1590_s24, 1 }
   0xb   : > { %p1667_p4 = por %p1950_p1, %p43_p0  ;;  %p185_p7 = scmp.lt.s32.totalorder %s1590_s24, 3 }
   0xc   : > { %p1672_p6 = por %p178_p3, %p43_p0  ;;  %s1592_s30 = smov [#allocation5]  }
   0xd   : > { %s1955_s27 = scalar_select %p1667_p4, 1, 0 }
   0xe   : > { %s1956_s28 = scalar_select %p1672_p6, 1, 0 }
   0xf   : > { %p1677_p8 = pnand %p1169_p5, %p185_p7  ;;  %s197_s7 = sshll.u32 %s1592_s30, 4  ;;  %s198_s7 = int_to_ptr.vmem [resolvable:$true] %s197_s7 }
  0x10   : > { %s1593_s9 = smov [#allocation7]   ;;  %s1453_s11 = scalar_lea.vmem %s198_s7, 128 }
  0x11   : > { %s1957_s29 = scalar_select %p1677_p8, 1, 0 }
  0x12   : > { %p1314_p9 = pneg %p1677_p8  ;;  %s210_s10 = sshll.u32 %s1593_s9, 4  ;;  %s211_s10 = int_to_ptr.vmem [resolvable:$true] %s210_s10 }
  0x13   : > { %p1454_p13 = scmp.ne.s32.totalorder %s198_s7, %s1453_s11  ;;  %p1461_p5 = scmp.lt.s32.totalorder %s198_s7, %s198_s7 }
  0x14   : > { %p1686_p11 = pnand %p1314_p9, %p1950_p1  ;;  %p1462_p7 = scmp.lt.s32.totalorder %s1453_s11, %s1453_s11 }
  0x16   : > { %p1444_p12 = pneg %p1686_p11  ;;  %p1463_p10 = por %p1462_p7, %p1461_p5 }
  0x18   : > { %p1456_p0 = pnand %p1454_p13, %p1444_p12 }
  0x1a   : > { %p1457_p3 = pneg %p1456_p0 }
  0x1c   : > { %p1464_p9 = pnand %p1463_p10, %p1457_p3 }
  0x1e   : > { %1467 = shalt.err (!%p1464_p9)
}
  0x1f   : > { %s1594_s12 = smov 64   ;;  %s1595_s13 = smov 4  }
  0x20   : > { %s1959_s1 = sld [smem:[#allocation12_spill]]  ;;  %s1479_s16 = scalar_lea.vmem %s211_s10, 256 }
  0x21   : > { %p1480_p1 = scmp.ne.s32.totalorder %s211_s10, %s1479_s16  ;;  %p1487_p2 = scmp.lt.s32.totalorder %s211_s10, %s211_s10 }
  0x22   : > { %p1488_p6 = scmp.lt.s32.totalorder %s1479_s16, %s1479_s16 }
  0x23   : > { %p1482_p13 = pnand %p1480_p1, %p1444_p12 }
  0x24   : > { %p1489_p5 = por %p1488_p6, %p1487_p2 }
  0x25   : > { %p1483_p0 = pneg %p1482_p13 }
  0x26   : > { %1317 = dma.hbm_to_vmem [thread:$0]  (!%p1686_p11), %s1959_s1, 128, %s198_s7, [#allocation6], %s1594_s12, %s1594_s12, %s1595_s13  }
  0x27   : > { %p1490_p10 = pnand %p1489_p5, %p1483_p0 }
  0x29   : > { %1493 = shalt.err (!%p1490_p10)
}
  0x2a   : > { %1320 = dma.hbm_to_vmem [thread:$0]  (!%p1686_p11), %s1945_s2, 256, %s211_s10, [#allocation6], %s1594_s12, %s1594_s12, %s1595_s13  }
  0x2b   : > { %s1709_s19 = sadd.s32 1, %s1590_s24   ;;  %s30_s20 = sadd.s32 1, %s1586_s23 }
  0x2c   : > { %s27_s26 = ssub.s32 %s1590_s24, %s1709_s19  ;;  %p37_p1 = scmp.ne.s32.totalorder %s1586_s23, %s1582_s22 }
  0x2d   : > { %p28_p2 = scmp.eq.s32.totalorder %s27_s26, 0  ;;  %p38_p6 = scmp.eq.s32.totalorder %s1590_s24, 0 }
  0x2e   : > { %p1960_p12 = scmp.eq.s32.totalorder %s1658_s25, 1  ;;  %p1331_p7 = scmp.lt.s32.totalorder %s1590_s24, 2 }
  0x2f   : > { %s1725_s7 = scalar_select %p28_p2, %s1586_s23, %s30_s20  }
  0x30   : > { %p1719_p3 = por %p1960_p12, %p37_p1  ;;  %p39_p9 = por %p38_p6, %p37_p1 }
  0x31   : > { %s233_s8 = sand.u32 1, %s1586_s23   ;;  %s1174_s10 = sshll.u32 %s1590_s24, 6 }
  0x32   : > { %s1961_s30 = scalar_select %p1719_p3, 1, 0 }
  0x33   : > { %s1173_s9 = sshll.u32 %s233_s8, 2  ;;  %s1732_s13 = scalar_lea.hbm %s1943_s0, %s1174_s10 }
  0x34   : > { %s237_s14 = scalar_lea.vmem [#allocation2], %s1173_s9  ;;  %p1734_p11 = pnand %p1331_p7, %p39_p9 }
  0x35   : > { %s244_s15 = sshll.u32 %s237_s14, 4  ;;  %s234_s17 = scalar_lea.sflag [#allocation3], %s233_s8  ;;  %s245_s15 = int_to_ptr.vmem [resolvable:$true] %s244_s15 }
  0x36   : > { %s1494_s18 = scalar_lea.hbm %s1732_s13, 64  ;;  %p1496_p0 = pneg %p1734_p11 }
  0x37   : > { %p1495_p13 = scmp.ne.s32.totalorder %s1732_s13, %s1494_s18  ;;  %s1499_s10 = scalar_lea.hbm %s1943_s0, 128 }
  0x38   : > { %p1500_p1 = scmp.lt.s32.totalorder %s1732_s13, %s1943_s0  ;;  %p1501_p2 = scmp.lt.s32.totalorder %s1499_s10, %s1494_s18 }
  0x39   : > { %p1497_p5 = pnand %p1496_p0, %p1495_p13 }
  0x3a   : > { %p1502_p6 = por %p1501_p2, %p1500_p1 }
  0x3b   : > { %p1498_p10 = pneg %p1497_p5 }
  0x3d   : > { %p1503_p12 = pnand %p1502_p6, %p1498_p10 }
  0x3f   : > { %1506 = shalt.err (!%p1503_p12)
}
  0x40   : > { %s1507_s12 = scalar_lea.vmem %s245_s15, 64  ;;  %s1596_s8 = smov [#allocation2]  }
  0x41   : > { %p1508_p7 = scmp.ne.s32.totalorder %s245_s15, %s1507_s12  ;;  %s1512_s14 = sshll.u32 %s1596_s8, 4  ;;  %s1513_s14 = int_to_ptr.vmem [resolvable:$false] %s1512_s14 }
  0x42   : > { %s1514_s1 = scalar_lea.vmem %s1513_s14, 128  ;;  %p1515_p13 = scmp.lt.s32.totalorder %s245_s15, %s1513_s14 }
  0x43   : > { %p1510_p9 = pnand %p1508_p7, %p1496_p0  ;;  %p1516_p5 = scmp.lt.s32.totalorder %s1514_s1, %s1507_s12 }
  0x45   : > { %p1511_p3 = pneg %p1510_p9  ;;  %p1517_p4 = por %p1516_p5, %p1515_p13 }
  0x47   : > { %p1518_p8 = pnand %p1517_p4, %p1511_p3 }
  0x49   : > { %1521 = shalt.err (!%p1518_p8)
}
  0x4a   : > { %1324 = dma.hbm_to_vmem [thread:$0]  (!%p1734_p11), %s1732_s13, 64, %s245_s15, %s234_s17  }
  0x4b   : > { %p1963_p10 = scmp.ne.s32.totalorder %s1957_s29, 0 }
  0x4c   : > { %s1755_s18 = sand.u32 (!%p1963_p10), 1, %s1582_s22   ;;  %p1964_p0 = scmp.ne.s32.totalorder (!%p1963_p10), %s1955_s27, 0 }
  0x4d   : > { %253 = sbr.rel (%p1963_p10) target bundleno = 5669 (0x1625), region = 44  ;;  %s1176_s20 = sshll.u32 (!%p1963_p10), %s1755_s18, 2 }
  0x4e   : > { %s256_s26 = scalar_lea.sflag (!%p1963_p10), [#allocation3], %s1755_s18  ;;  %s259_s10 = scalar_lea.vmem (!%p1963_p10), [#allocation2], %s1176_s20 }
  0x52   : > { %1565 = dma.done.wait (%p1964_p0), %s256_s26, 64  }
  0x53   : > { %1567 = vsyncadd (%p1964_p0), %s256_s26, 4294967232  ;;  %p1965_p4 = scmp.eq.s32.totalorder %s1658_s25, 0 }
  0x55   : > { %1569 = dma.done.wait (%p1965_p4), [#allocation6], 384   ;;  %p1966_p8 = pmov %p1965_p4 }
  0x56   : > { %v1597_v0 = vmov 0.0   ;;  %vm1598_vm0 = vmmov 0   ;;  %v1375_v1 = vld [vmem:[#allocation5] sm:$0xff]   ;;  %v1773_v2 = vld [vmem:[#allocation7 + $0x8] sm:$0xff]   ;;  %vm313_vm1 = vcmask 130048   ;;  %v1776_v4 = vld [vmem:[#allocation7] sm:$0xff]   ;;  %v363_v53 = vlaneseq }
  0x57   : > { %1571 = vsyncadd (%p1966_p8), [#allocation6], 4294966912  ;;  %1232 = vmatprep.subr.bf16.mxu0 %v1597_v0  ;;  %1238 = vmatprep.subr.bf16.mxu1 %v1597_v0  ;;  %v297_v3 = vld [vmem:[%s259_s10] sm:$0xf]  ;;  %vm378_vm2 = vcmask 261120   ;;  %s1599_s15 = smov 64  }
  0x58   : > { %1234 = vmatprep.mubr.msk.bf16.mxu0 %vm1598_vm0, %v1597_v0  ;;  %1242 = vmatprep.mubr.msk.bf16.mxu1 %vm1598_vm0, %v1597_v0  ;;  %v361_v5 = vld [vmem:[%s1947_s4] sm:$0x1]  ;;  %s1600_s11 = smov 32   ;;  %v1823_v54 = vshrl.u32 %v363_v53, 7  ;;  %s1179_s9 = sshll.u32 %s1755_s18, 3 }
  0x59   : > { %1233 = vmatpush3.bf16.msra.mxu0 %v1375_v1  ;;  %1239 = vmatpush3.bf16.msra.mxu1 %v1773_v2  ;;  %v365_v6 = vpack.c.bf16 %v361_v5, %v361_v5  ;;  %v1180_v7 = vld [vmem:[%s1946_s3] ss:$0 sm:$0xff]  ;;  %s1203_s12 = sshll.u32 %s1658_s25, 7  ;;  %s295_s8 = scalar_lea.vmem [#allocation8], %s1179_s9 }
  0x5a   : > { %1246 = vmatprep.subr.bf16.mxu0 %v1597_v0  ;;  %1240 = vmatprep.subr.bf16.mxu1 %v1597_v0  ;;  %v1187_v19 = vld [vmem:[%s1948_s5] ss:$0 sm:$0xff]  ;;  %v458_v55 = vsub.s32 0, %v1823_v54  ;;  %v542_v56 = vsub.s32 1, %v1823_v54  ;;  %vm455_vm3 = vcmp.eq.s32.totalorder %v1823_v54, 0  ;;  %vm539_vm4 = vcmp.eq.s32.totalorder %v1823_v54, 1  ;;  %s1905_s10 = scalar_lea.hbm %s1949_s6, %s1203_s12 }
  0x5b   : > { %vm625_vm5 = vcmp.eq.s32.totalorder %v1823_v54, 2  ;;  %vm710_vm6 = vcmp.eq.s32.totalorder %v1823_v54, 3  ;;  %vm797_vm7 = vcmp.eq.s32.totalorder %v1823_v54, 4  ;;  %vm882_vm8 = vcmp.eq.s32.totalorder %v1823_v54, 5  ;;  %s1079_s14 = sshll.u32 %s295_s8, 4  ;;  %s1066_s1 = scalar_lea.sflag [#allocation4], %s1755_s18  ;;  %s1080_s14 = int_to_ptr.vmem [resolvable:$true] %s1079_s14 }
  0x5c   : > { %1235 = vmatmul.mubr.msk.bf16.vlgmr.msra.gmra.mxu0 %vm313_vm1, %v297_v3  ;;  %vm969_vm9 = vcmp.eq.s32.totalorder %v1823_v54, 6  ;;  %vm1054_vm10 = vcmp.eq.s32.totalorder %v1823_v54, 7  ;;  %s1522_s27 = scalar_lea.vmem %s1080_s14, 128  ;;  %p1967_p11 = scmp.ne.s32.totalorder %s1961_s30, 0 }
  0x5d   : > { %1247 = vmatpush3.bf16.msra.mxu0 %v1773_v2  ;;  %1250 = vmatprep.mubr.msk.bf16.mxu0 %vm1598_vm0, %v1597_v0  ;;  %p1523_p3 = scmp.ne.s32.totalorder %s1080_s14, %s1522_s27  ;;  %s1601_s29 = smov [#allocation8]  }
  0x5e   : > { %1241 = vmatpush3.bf16.msra.mxu1 %v1776_v4  ;;  %1248 = vmatprep.subr.bf16.mxu0 %v1597_v0  ;;  %s1526_s13 = sshll.u32 %s1601_s29, 4  ;;  %s1527_s13 = int_to_ptr.vmem [resolvable:$false] %s1526_s13 }
  0x5f   : > { %1254 = vmatprep.subr.bf16.mxu1 %v1597_v0  ;;  %p1524_p1 = pnand %p1523_p3, %p1967_p11  ;;  %s1528_s25 = scalar_lea.vmem %s1527_s13, 256 }
  0x60   : > { %p1529_p6 = scmp.lt.s32.totalorder %s1080_s14, %s1527_s13  ;;  %p1530_p12 = scmp.lt.s32.totalorder %s1528_s25, %s1522_s27 }
  0x61   : > { %1243 = vmatmul.mubr.msk.bf16.vlgmr.msra.gmra.mxu1 %vm378_vm2, %v365_v6  ;;  %1249 = vmatpush3.bf16.msra.mxu0 %v1776_v4  ;;  %p1525_p2 = pneg %p1524_p1 }
  0x62   : > { %1255 = vmatpush3.bf16.msra.mxu1 %v1773_v2  ;;  %1258 = vmatprep.mubr.msk.bf16.mxu1 %vm1598_vm0, %v1597_v0  ;;  %p1531_p7 = por %p1530_p12, %p1529_p6 }
  0x63   : > { %1256 = vmatprep.subr.bf16.mxu1 %v1597_v0  ;;  %1262 = vmatprep.subr.bf16.mxu0 %v1597_v0 }
  0x64   : > { %p1532_p9 = pnand %p1531_p7, %p1525_p2 }
  0x66   : > { %1257 = vmatpush3.bf16.msra.mxu1 %v1776_v4 }
  0x67   : > { %1270 = vmatprep.subr.bf16.mxu1 %v1597_v0 }
 0x11c   : > { %v351_v8 = vpop.f32.mrf.mxu0 }
 0x11d   : > { %v1801_v9 = vadd.f32 %v1180_v7, %v351_v8 }
 0x11e   : > { %v1236_v10 = vpop.f32.mrf.mxu0 }
 0x120   : > { %v354_v11 = vpop.f32.mrf.mxu0 }
 0x121   : > { %v416_v12 = vpop.f32.mrf.mxu1 }
 0x122   : > { %v422_v13 = vadd.f32 %v416_v12, %v1801_v9  ;;  %v1237_v14 = vpop.f32.mrf.mxu0 }
 0x123   : > { %v1244_v15 = vpop.f32.mrf.mxu1 }
 0x124   : > { %1378 = vtanh.f32 %v422_v13  ;;  %v1186_v20 = vmul.f32 -1.442695, %v422_v13 }
 0x125   : > { %v419_v16 = vpop.f32.mrf.mxu1 }
 0x126   : > { %1380 = vpow2.f32 %v1186_v20 }
 0x127   : > { %v1245_v17 = vpop.f32.mrf.mxu1 }
 0x131   : > { %v1379_v18 = vpop.eup %1378 }
 0x132   : > { %440 = vrot.lane.b32.xlu0 %v1379_v18, %s1599_s15 }
 0x133   : > { %v1381_v21 = vpop.eup %1380 }
 0x134   : > { %v426_v22 = vadd.f32 1.0, %v1381_v21 }
 0x136   : > { %435 = vrot.lane.b32.xlu0 %v1187_v19, %s1600_s11  ;;  %1382 = vrcp.f32 %v426_v22 }
 0x143   : > { %v1383_v23 = vpop.eup %1382 }
 0x1a4   : > { %v441_v24 = vpop.permute.xlu0 %440 }
 0x1a5   : > { %v443_v25 = vmul.f32 %v1383_v23, %v441_v24  ;;  %v628_v24 = vsub.s32 2, %v1823_v54 }
 0x1a7   : > { %445 = vrot.lane.b32.xlu1 %v443_v25, %s1600_s11 }
 0x1a8   : > { %v436_v26 = vpop.permute.xlu0 %435 }
 0x1a9   : > { %v438_v27 = vmul.f32 %v1383_v23, %v436_v26 }
 0x219   : > { %v446_v28 = vpop.permute.xlu1 %445 }
 0x21a   : > { %v448_v29 = vadd.f32 %v446_v28, %v438_v27 }
 0x21c   : > { %1384 = vtanh.f32 %v448_v29  ;;  %v520_v48 = vrot.slane %v448_v29, 7 }
 0x229   : > { %v1385_v30 = vpop.eup %1384 }
 0x22a   : > { %451 = vrot.lane.b32.xlu1 %v1385_v30, %s1599_s15 }
 0x29c   : > { %v452_v31 = vpop.permute.xlu1 %451 }
 0x29d   : > { %v454_v32 = vmul.f32 %v1383_v23, %v452_v31 }
 0x29f   : > { %v461_v33 = vpack.c.bf16 %v454_v32, %v454_v32  ;;  %v459_v57 = vrot.slane %v454_v32, %v458_v55 }
 0x2a1   : > { %463 = vrot.lane.b32.xlu0 %v461_v33, %s1600_s11  ;;  %v460_v62 = vsel %vm455_vm3, %v459_v57, 0.0 }
 0x313   : > { %v464_v34 = vpop.permute.xlu0 %463 }
 0x314   : > { %1251 = vmatmul.mubr.msk.bf16.vlgmr.msra.gmra.mxu0 %vm378_vm2, %v464_v34 }
 0x315   : > { %1263 = vmatpush3.bf16.msra.mxu0 %v1773_v2  ;;  %1266 = vmatprep.mubr.msk.bf16.mxu0 %vm1598_vm0, %v1597_v0 }
 0x316   : > { %1264 = vmatprep.subr.bf16.mxu0 %v1597_v0 }
 0x319   : > { %1265 = vmatpush3.bf16.msra.mxu0 %v1776_v4 }
 0x31a   : > { %1278 = vmatprep.subr.bf16.mxu0 %v1597_v0 }
 0x3d4   : > { %v502_v35 = vpop.f32.mrf.mxu0 }
 0x3d5   : > { %v509_v36 = vrot.slane %v502_v35, 7 }
 0x3d6   : > { %v1252_v37 = vpop.f32.mrf.mxu0 }
 0x3d7   : > { %v511_v38 = vadd.f32 %v509_v36, %v1801_v9 }
 0x3d8   : > { %v505_v39 = vpop.f32.mrf.mxu0 }
 0x3d9   : > { %1386 = vtanh.f32 %v511_v38  ;;  %v1189_v42 = vmul.f32 -1.442695, %v511_v38 }
 0x3da   : > { %v1253_v40 = vpop.f32.mrf.mxu0 }
 0x3db   : > { %1388 = vpow2.f32 %v1189_v42 }
 0x3e6   : > { %v1387_v41 = vpop.eup %1386 }
 0x3e7   : > { %524 = vrot.lane.b32.xlu1 %v1387_v41, %s1599_s15 }
 0x3e8   : > { %v1389_v43 = vpop.eup %1388 }
 0x3e9   : > { %v515_v44 = vadd.f32 1.0, %v1389_v43 }
 0x3eb   : > { %1390 = vrcp.f32 %v515_v44 }
 0x3f8   : > { %v1391_v45 = vpop.eup %1390 }
 0x3f9   : > { %v522_v49 = vmul.f32 %v1391_v45, %v520_v48 }
 0x459   : > { %v525_v46 = vpop.permute.xlu1 %524 }
 0x45a   : > { %v527_v47 = vmul.f32 %v1391_v45, %v525_v46 }
 0x45c   : > { %529 = vrot.lane.b32.xlu0 %v527_v47, %s1600_s11 }
 0x4ce   : > { %v530_v50 = vpop.permute.xlu0 %529 }
 0x4cf   : > { %v532_v51 = vadd.f32 %v530_v50, %v522_v49  ;;  %v713_v50 = vsub.s32 3, %v1823_v54 }
 0x4d1   : > { %1392 = vtanh.f32 %v532_v51  ;;  %v606_v19 = vrot.slane %v532_v51, 7 }
 0x4de   : > { %v1393_v52 = vpop.eup %1392 }
 0x4df   : > { %535 = vrot.lane.b32.xlu1 %v1393_v52, %s1599_s15 }
 0x551   : > { %v536_v58 = vpop.permute.xlu1 %535 }
 0x552   : > { %v538_v59 = vmul.f32 %v1391_v45, %v536_v58 }
 0x554   : > { %v543_v60 = vrot.slane %v538_v59, %v542_v56  ;;  %v545_v61 = vpack.c.bf16 %v538_v59, %v538_v59 }
 0x556   : > { %v544_v63 = vsel %vm539_vm4, %v543_v60, %v460_v62  ;;  %v547_v1 = vshrl.u32 %v545_v61, 16 }
 0x558   : > { %549 = vrot.lane.b32.xlu0 %v547_v1, %s1600_s11 }
 0x5ca   : > { %v550_v3 = vpop.permute.xlu0 %549 }
 0x5cb   : > { %1259 = vmatmul.mubr.msk.bf16.vlgmr.msra.gmra.mxu1 %vm378_vm2, %v550_v3 }
 0x5cc   : > { %1271 = vmatpush3.bf16.msra.mxu1 %v1773_v2  ;;  %1274 = vmatprep.mubr.msk.bf16.mxu1 %vm1598_vm0, %v1597_v0 }
 0x5cd   : > { %1272 = vmatprep.subr.bf16.mxu1 %v1597_v0 }
 0x5d0   : > { %1273 = vmatpush3.bf16.msra.mxu1 %v1776_v4 }
 0x5d1   : > { %1286 = vmatprep.subr.bf16.mxu1 %v1597_v0 }
 0x68b   : > { %v588_v5 = vpop.f32.mrf.mxu1 }
 0x68c   : > { %v595_v6 = vrot.slane %v588_v5, 6 }
 0x68d   : > { %v1260_v7 = vpop.f32.mrf.mxu1 }
 0x68e   : > { %v597_v8 = vadd.f32 %v595_v6, %v1801_v9 }
 0x68f   : > { %v591_v10 = vpop.f32.mrf.mxu1 }
 0x690   : > { %1394 = vtanh.f32 %v597_v8  ;;  %v1191_v13 = vmul.f32 -1.442695, %v597_v8 }
 0x691   : > { %v1261_v11 = vpop.f32.mrf.mxu1 }
 0x692   : > { %1396 = vpow2.f32 %v1191_v13 }
 0x69d   : > { %v1395_v12 = vpop.eup %1394 }
 0x69e   : > { %610 = vrot.lane.b32.xlu1 %v1395_v12, %s1599_s15 }
 0x69f   : > { %v1397_v14 = vpop.eup %1396 }
 0x6a0   : > { %v601_v15 = vadd.f32 1.0, %v1397_v14 }
 0x6a2   : > { %1398 = vrcp.f32 %v601_v15 }
 0x6af   : > { %v1399_v16 = vpop.eup %1398 }
 0x6b0   : > { %v608_v20 = vmul.f32 %v1399_v16, %v606_v19 }
 0x710   : > { %v611_v17 = vpop.permute.xlu1 %610 }
 0x711   : > { %v613_v18 = vmul.f32 %v1399_v16, %v611_v17 }
 0x713   : > { %615 = vrot.lane.b32.xlu0 %v613_v18, %s1600_s11  ;;  %v800_v18 = vsub.s32 4, %v1823_v54 }
 0x785   : > { %v616_v21 = vpop.permute.xlu0 %615 }
 0x786   : > { %v618_v22 = vadd.f32 %v616_v21, %v608_v20 }
 0x788   : > { %1400 = vtanh.f32 %v618_v22  ;;  %v691_v45 = vrot.slane %v618_v22, 7 }
 0x795   : > { %v1401_v23 = vpop.eup %1400 }
 0x796   : > { %621 = vrot.lane.b32.xlu1 %v1401_v23, %s1599_s15 }
 0x808   : > { %v622_v25 = vpop.permute.xlu1 %621 }
 0x809   : > { %v624_v26 = vmul.f32 %v1399_v16, %v622_v25 }
 0x80b   : > { %v629_v27 = vrot.slane %v624_v26, %v628_v24  ;;  %v631_v28 = vpack.c.bf16 %v624_v26, %v624_v26 }
 0x80d   : > { %v630_v29 = vsel %vm625_vm5, %v629_v27, %v544_v63  ;;  %v633_v30 = vrot.slane %v631_v28, 1 }
 0x80f   : > { %634 = vrot.lane.b32.xlu0 %v633_v30, %s1600_s11 }
 0x881   : > { %v635_v31 = vpop.permute.xlu0 %634 }
 0x882   : > { %1267 = vmatmul.mubr.msk.bf16.vlgmr.msra.gmra.mxu0 %vm378_vm2, %v635_v31 }
 0x883   : > { %1279 = vmatpush3.bf16.msra.mxu0 %v1773_v2  ;;  %1282 = vmatprep.mubr.msk.bf16.mxu0 %vm1598_vm0, %v1597_v0 }
 0x884   : > { %1280 = vmatprep.subr.bf16.mxu0 %v1597_v0 }
 0x887   : > { %1281 = vmatpush3.bf16.msra.mxu0 %v1776_v4 }
 0x888   : > { %1294 = vmatprep.subr.bf16.mxu0 %v1597_v0 }
 0x942   : > { %v673_v32 = vpop.f32.mrf.mxu0 }
 0x943   : > { %v680_v33 = vrot.slane %v673_v32, 5 }
 0x944   : > { %v1268_v34 = vpop.f32.mrf.mxu0 }
 0x945   : > { %v682_v35 = vadd.f32 %v680_v33, %v1801_v9 }
 0x946   : > { %v676_v36 = vpop.f32.mrf.mxu0 }
 0x947   : > { %1402 = vtanh.f32 %v682_v35  ;;  %v1193_v39 = vmul.f32 -1.442695, %v682_v35 }
 0x948   : > { %v1269_v37 = vpop.f32.mrf.mxu0 }
 0x949   : > { %1404 = vpow2.f32 %v1193_v39 }
 0x954   : > { %v1403_v38 = vpop.eup %1402 }
 0x955   : > { %695 = vrot.lane.b32.xlu1 %v1403_v38, %s1599_s15 }
 0x956   : > { %v1405_v40 = vpop.eup %1404 }
 0x957   : > { %v686_v41 = vadd.f32 1.0, %v1405_v40 }
 0x959   : > { %1406 = vrcp.f32 %v686_v41  ;;  %v885_v41 = vsub.s32 5, %v1823_v54 }
 0x966   : > { %v1407_v42 = vpop.eup %1406 }
 0x967   : > { %v693_v46 = vmul.f32 %v1407_v42, %v691_v45 }
 0x9c7   : > { %v696_v43 = vpop.permute.xlu1 %695 }
 0x9c8   : > { %v698_v44 = vmul.f32 %v1407_v42, %v696_v43 }
 0x9ca   : > { %700 = vrot.lane.b32.xlu0 %v698_v44, %s1600_s11 }
 0xa3c   : > { %v701_v47 = vpop.permute.xlu0 %700 }
 0xa3d   : > { %v703_v48 = vadd.f32 %v701_v47, %v693_v46 }
 0xa3f   : > { %1408 = vtanh.f32 %v703_v48  ;;  %v778_v13 = vrot.slane %v703_v48, 7 }
 0xa4c   : > { %v1409_v49 = vpop.eup %1408 }
 0xa4d   : > { %706 = vrot.lane.b32.xlu1 %v1409_v49, %s1599_s15 }
 0xabf   : > { %v707_v51 = vpop.permute.xlu1 %706 }
 0xac0   : > { %v709_v52 = vmul.f32 %v1407_v42, %v707_v51 }
 0xac2   : > { %v714_v53 = vrot.slane %v709_v52, %v713_v50  ;;  %v716_v55 = vpack.c.bf16 %v709_v52, %v709_v52 }
 0xac4   : > { %v715_v56 = vsel %vm710_vm6, %v714_v53, %v630_v29  ;;  %v718_v57 = vshrl.u32 %v716_v55, 16 }
 0xac6   : > { %v720_v58 = vrot.slane %v718_v57, 1 }
 0xac8   : > { %721 = vrot.lane.b32.xlu0 %v720_v58, %s1600_s11 }
 0xb3a   : > { %v722_v59 = vpop.permute.xlu0 %721 }
 0xb3b   : > { %1275 = vmatmul.mubr.msk.bf16.vlgmr.msra.gmra.mxu1 %vm378_vm2, %v722_v59 }
 0xb3c   : > { %1287 = vmatpush3.bf16.msra.mxu1 %v1773_v2  ;;  %1290 = vmatprep.mubr.msk.bf16.mxu1 %vm1598_vm0, %v1597_v0 }
 0xb3d   : > { %1288 = vmatprep.subr.bf16.mxu1 %v1597_v0 }
 0xb40   : > { %1289 = vmatpush3.bf16.msra.mxu1 %v1776_v4 }
 0xbfb   : > { %v760_v60 = vpop.f32.mrf.mxu1 }
 0xbfc   : > { %v767_v61 = vrot.slane %v760_v60, 4 }
 0xbfd   : > { %v1276_v62 = vpop.f32.mrf.mxu1 }
 0xbfe   : > { %v769_v63 = vadd.f32 %v767_v61, %v1801_v9 }
 0xbff   : > { %v763_v1 = vpop.f32.mrf.mxu1 }
 0xc00   : > { %1410 = vtanh.f32 %v769_v63  ;;  %v1195_v6 = vmul.f32 -1.442695, %v769_v63 }
 0xc01   : > { %v1277_v3 = vpop.f32.mrf.mxu1 }
 0xc02   : > { %1412 = vpow2.f32 %v1195_v6 }
 0xc0d   : > { %v1411_v5 = vpop.eup %1410 }
 0xc0e   : > { %782 = vrot.lane.b32.xlu1 %v1411_v5, %s1599_s15 }
 0xc0f   : > { %v1413_v7 = vpop.eup %1412 }
 0xc10   : > { %v773_v8 = vadd.f32 1.0, %v1413_v7 }
 0xc12   : > { %1414 = vrcp.f32 %v773_v8  ;;  %v972_v8 = vsub.s32 6, %v1823_v54 }
 0xc1f   : > { %v1415_v10 = vpop.eup %1414 }
 0xc20   : > { %v780_v14 = vmul.f32 %v1415_v10, %v778_v13 }
 0xc80   : > { %v783_v11 = vpop.permute.xlu1 %782 }
 0xc81   : > { %v785_v12 = vmul.f32 %v1415_v10, %v783_v11 }
 0xc83   : > { %787 = vrot.lane.b32.xlu0 %v785_v12, %s1600_s11 }
 0xcf5   : > { %v788_v15 = vpop.permute.xlu0 %787 }
 0xcf6   : > { %v790_v16 = vadd.f32 %v788_v15, %v780_v14 }
 0xcf8   : > { %1416 = vtanh.f32 %v790_v16 }
 0xd05   : > { %v1417_v17 = vpop.eup %1416 }
 0xd06   : > { %793 = vrot.lane.b32.xlu1 %v1417_v17, %s1599_s15 }
 0xd78   : > { %v794_v19 = vpop.permute.xlu1 %793 }
 0xd79   : > { %v796_v20 = vmul.f32 %v1415_v10, %v794_v19 }
 0xd7b   : > { %v801_v21 = vrot.slane %v796_v20, %v800_v18  ;;  %v803_v22 = vpack.c.bf16 %v796_v20, %v796_v20 }
 0xd7d   : > { %v802_v23 = vsel %vm797_vm7, %v801_v21, %v715_v56  ;;  %v805_v24 = vrot.slane %v803_v22, 2 }
 0xd7f   : > { %806 = vrot.lane.b32.xlu0 %v805_v24, %s1600_s11 }
 0xdf1   : > { %v807_v25 = vpop.permute.xlu0 %806 }
 0xdf2   : > { %1283 = vmatmul.mubr.msk.bf16.vlgmr.msra.gmra.mxu0 %vm378_vm2, %v807_v25 }
 0xdf3   : > { %1295 = vmatpush3.bf16.msra.mxu0 %v1773_v2  ;;  %1298 = vmatprep.mubr.msk.bf16.mxu0 %vm1598_vm0, %v1597_v0 }
 0xdf4   : > { %1296 = vmatprep.subr.bf16.mxu0 %v1597_v0 }
 0xdf7   : > { %1297 = vmatpush3.bf16.msra.mxu0 %v1776_v4  ;;  %v863_v4 = vrot.slane %v790_v16, 7 }
 0xeb2   : > { %v845_v26 = vpop.f32.mrf.mxu0 }
 0xeb3   : > { %v852_v27 = vrot.slane %v845_v26, 3 }
 0xeb4   : > { %v1284_v28 = vpop.f32.mrf.mxu0 }
 0xeb5   : > { %v854_v29 = vadd.f32 %v852_v27, %v1801_v9 }
 0xeb6   : > { %v848_v30 = vpop.f32.mrf.mxu0 }
 0xeb7   : > { %1418 = vtanh.f32 %v854_v29  ;;  %v1197_v33 = vmul.f32 -1.442695, %v854_v29 }
 0xeb8   : > { %v1285_v31 = vpop.f32.mrf.mxu0 }
 0xeb9   : > { %1420 = vpow2.f32 %v1197_v33 }
 0xec4   : > { %v1419_v32 = vpop.eup %1418 }
 0xec5   : > { %867 = vrot.lane.b32.xlu1 %v1419_v32, %s1599_s15 }
 0xec6   : > { %v1421_v2 = vpop.eup %1420 }
 0xec7   : > { %v858_v34 = vadd.f32 1.0, %v1421_v2  ;;  %v1057_v2 = vsub.s32 7, %v1823_v54 }
 0xec9   : > { %1422 = vrcp.f32 %v858_v34 }
 0xed6   : > { %v1423_v35 = vpop.eup %1422 }
 0xed7   : > { %v865_v37 = vmul.f32 %v1423_v35, %v863_v4 }
 0xf37   : > { %v868_v0 = vpop.permute.xlu1 %867 }
 0xf38   : > { %v870_v36 = vmul.f32 %v1423_v35, %v868_v0 }
 0xf3a   : > { %872 = vrot.lane.b32.xlu0 %v870_v36, %s1600_s11 }
 0xfac   : > { %v873_v38 = vpop.permute.xlu0 %872 }
 0xfad   : > { %v875_v39 = vadd.f32 %v873_v38, %v865_v37 }
 0xfaf   : > { %1424 = vtanh.f32 %v875_v39  ;;  %v950_v1 = vrot.slane %v875_v39, 7 }
 0xfbc   : > { %v1425_v40 = vpop.eup %1424 }
 0xfbd   : > { %878 = vrot.lane.b32.xlu1 %v1425_v40, %s1599_s15 }
0x102f   : > { %v879_v42 = vpop.permute.xlu1 %878 }
0x1030   : > { %v881_v43 = vmul.f32 %v1423_v35, %v879_v42 }
0x1032   : > { %v886_v44 = vrot.slane %v881_v43, %v885_v41  ;;  %v888_v45 = vpack.c.bf16 %v881_v43, %v881_v43 }
0x1034   : > { %v890_v46 = vshrl.u32 %v888_v45, 16  ;;  %v887_v47 = vsel %vm882_vm8, %v886_v44, %v802_v23 }
0x1036   : > { %v892_v48 = vrot.slane %v890_v46, 2 }
0x1038   : > { %893 = vrot.lane.b32.xlu0 %v892_v48, %s1600_s11 }
0x10aa   : > { %v894_v49 = vpop.permute.xlu0 %893 }
0x10ab   : > { %1291 = vmatmul.mubr.msk.bf16.vlgmr.msra.gmra.mxu1 %vm378_vm2, %v894_v49 }
0x116b   : > { %v932_v50 = vpop.f32.mrf.mxu1 }
0x116c   : > { %v939_v51 = vrot.slane %v932_v50, 2 }
0x116d   : > { %v1292_v52 = vpop.f32.mrf.mxu1 }
0x116e   : > { %v941_v53 = vadd.f32 %v939_v51, %v1801_v9 }
0x116f   : > { %v935_v55 = vpop.f32.mrf.mxu1 }
0x1170   : > { %1426 = vtanh.f32 %v941_v53  ;;  %v1199_v58 = vmul.f32 -1.442695, %v941_v53 }
0x1171   : > { %v1293_v56 = vpop.f32.mrf.mxu1 }
0x1172   : > { %1428 = vpow2.f32 %v1199_v58 }
0x117d   : > { %v1427_v57 = vpop.eup %1426 }
0x117e   : > { %954 = vrot.lane.b32.xlu1 %v1427_v57, %s1599_s15 }
0x117f   : > { %v1429_v59 = vpop.eup %1428 }
0x1180   : > { %v945_v60 = vadd.f32 1.0, %v1429_v59 }
0x1182   : > { %1430 = vrcp.f32 %v945_v60 }
0x118f   : > { %v1431_v61 = vpop.eup %1430 }
0x1190   : > { %v952_v3 = vmul.f32 %v1431_v61, %v950_v1 }
0x11f0   : > { %v955_v62 = vpop.permute.xlu1 %954 }
0x11f1   : > { %v957_v63 = vmul.f32 %v1431_v61, %v955_v62 }
0x11f3   : > { %959 = vrot.lane.b32.xlu0 %v957_v63, %s1600_s11 }
0x1265   : > { %v960_v5 = vpop.permute.xlu0 %959 }
0x1266   : > { %v962_v6 = vadd.f32 %v960_v5, %v952_v3 }
0x1268   : > { %1432 = vtanh.f32 %v962_v6  ;;  %v1035_v30 = vrot.slane %v962_v6, 7 }
0x1275   : > { %v1433_v7 = vpop.eup %1432 }
0x1276   : > { %965 = vrot.lane.b32.xlu1 %v1433_v7, %s1599_s15 }
0x12e8   : > { %v966_v10 = vpop.permute.xlu1 %965 }
0x12e9   : > { %v968_v11 = vmul.f32 %v1431_v61, %v966_v10 }
0x12eb   : > { %v973_v12 = vrot.slane %v968_v11, %v972_v8  ;;  %v975_v13 = vpack.c.bf16 %v968_v11, %v968_v11 }
0x12ed   : > { %v977_v14 = vrot.slane %v975_v13, 3  ;;  %v974_v15 = vsel %vm969_vm9, %v973_v12, %v887_v47 }
0x12ef   : > { %978 = vrot.lane.b32.xlu0 %v977_v14, %s1600_s11 }
0x1361   : > { %v979_v16 = vpop.permute.xlu0 %978 }
0x1362   : > { %1299 = vmatmul.mubr.msk.bf16.vlgmr.msra.gmra.mxu0 %vm378_vm2, %v979_v16 }
0x1422   : > { %v1017_v17 = vpop.f32.mrf.mxu0 }
0x1423   : > { %v1024_v18 = vrot.slane %v1017_v17, 1 }
0x1424   : > { %v1300_v19 = vpop.f32.mrf.mxu0 }
0x1425   : > { %v1026_v20 = vadd.f32 %v1024_v18, %v1801_v9 }
0x1426   : > { %v1020_v21 = vpop.f32.mrf.mxu0 }
0x1427   : > { %1434 = vtanh.f32 %v1026_v20  ;;  %v1201_v24 = vmul.f32 -1.442695, %v1026_v20 }
0x1428   : > { %v1301_v22 = vpop.f32.mrf.mxu0 }
0x1429   : > { %1436 = vpow2.f32 %v1201_v24 }
0x1434   : > { %v1435_v23 = vpop.eup %1434 }
0x1435   : > { %1039 = vrot.lane.b32.xlu1 %v1435_v23, %s1599_s15 }
0x1436   : > { %v1437_v25 = vpop.eup %1436 }
0x1437   : > { %v1030_v26 = vadd.f32 1.0, %v1437_v25 }
0x1439   : > { %1438 = vrcp.f32 %v1030_v26 }
0x1446   : > { %v1439_v27 = vpop.eup %1438 }
0x1447   : > { %v1037_v9 = vmul.f32 %v1439_v27, %v1035_v30 }
0x14a7   : > { %v1040_v28 = vpop.permute.xlu1 %1039 }
0x14a8   : > { %v1042_v29 = vmul.f32 %v1439_v27, %v1040_v28 }
0x14aa   : > { %1044 = vrot.lane.b32.xlu0 %v1042_v29, %s1600_s11 }
0x151c   : > { %v1045_v31 = vpop.permute.xlu0 %1044 }
0x151d   : > { %v1047_v32 = vadd.f32 %v1045_v31, %v1037_v9 }
0x151f   : > { %1440 = vtanh.f32 %v1047_v32 }
0x152c   : > { %v1441_v33 = vpop.eup %1440 }
0x152d   : > { %1050 = vrot.lane.b32.xlu1 %v1441_v33, %s1599_s15 }
0x159f   : > { %v1051_v34 = vpop.permute.xlu1 %1050 }
0x15a0   : > { %v1053_v35 = vmul.f32 %v1439_v27, %v1051_v34 }
0x15a2   : > { %v1058_v0 = vrot.slane %v1053_v35, %v1057_v2 }
0x15a4   : > { %v1059_v36 = vsel %vm1054_vm10, %v1058_v0, %v974_v15 }
0x15a5   : > { %1061 = vrot.lane.b32.xlu0 %v1059_v36, %s1600_s11 }
0x1617   : > { %v1062_v4 = vpop.permute.xlu0 %1061 }
0x1618   : > { %1064 = vst.msk [vmem:[%s295_s8] sm:$0xff] %vm378_vm2, %v1062_v4 }
0x1619   : > { %1535 = shalt.err (!%p1532_p9)
}
0x161a   : > { %s1536_s15 = scalar_lea.hbm %s1905_s10, 128  ;;  %s1540_s17 = scalar_lea.hbm %s1949_s6, 256 }
0x161b   : > { %p1537_p13 = scmp.ne.s32.totalorder %s1905_s10, %s1536_s15  ;;  %p1541_p0 = scmp.lt.s32.totalorder %s1905_s10, %s1949_s6 }
0x161c   : > { %p1542_p4 = scmp.lt.s32.totalorder %s1540_s17, %s1536_s15 }
0x161d   : > { %p1538_p5 = pnand %p1537_p13, %p1967_p11 }
0x161e   : > { %p1543_p8 = por %p1542_p4, %p1541_p0 }
0x161f   : > { %p1539_p10 = pneg %p1538_p5 }
0x1621   : > { %p1544_p3 = pnand %p1543_p8, %p1539_p10 }
0x1623   : > { %1547 = shalt.err (!%p1544_p3)
}
0x1624   : > { %1312 = dma.vmem_to_hbm [thread:$0]  (%p1967_p11), %s1080_s14, 128, %s1905_s10, %s1066_s1  }
0x1625 PF: > { %s1091_s12 = sand.u32 1, %s1578_s21   ;;  %p1968_p1 = scmp.ne.s32.totalorder %s1956_s28, 0 }
0x1626   : > { %p1969_p2 = scmp.ge.s32.totalorder %s1590_s24, 2  ;;  %s1092_s8 = scalar_lea.sflag [#allocation4], %s1091_s12 }
0x1628   : > { %p1326_p6 = pnand %p1969_p2, %p1968_p1 }
0x162a   : > { %p1327_p12 = pneg %p1326_p6 }
0x162c   : > { %1573 = dma.done.wait (%p1327_p12), %s1092_s8, 128  }
0x162d   : > { %1575 = vsyncadd (%p1327_p12), %s1092_s8, 4294967168  ;;  %p20_p7 = scmp.ge.s32.totalorder %s1709_s19, 4   ;;  %s1970_s21 = smov %s1582_s22 }
0x162e   : > { %s1971_s22 = smov %s1586_s23  ;;  %s1972_s23 = smov %s1725_s7 }
0x162f   : > { %s1973_s24 = smov %s1709_s19  ;;  %22 = sbr.rel (!%p20_p7) target bundleno = 8 (0x8), region = 97 }
0x1634   :  { %1097 = vsyncpa [#allocation3], 1 }
0x1635   :  { %1099 = vsyncpa [#allocation3 + $0x1], 1 }
0x1636   :  { %1100 = vsyncpa [#allocation6], 1 }
0x1637   :  { %1101 = vsyncpa [#allocation4], 1 }
0x1638   :  { %1103 = vsyncpa [#allocation4 + $0x1], 1 }

</bundles_post_ra>
